<compile_context>
chip_gen: v7x
topology: tpu7x:2x2x1
jax: 0.10.0
libtpu: 0.0.40
codegen_flags: <defaults>
</compile_context>

<pallas_src>
import functools

import jax
import jax.numpy as jnp
from jax.experimental import pallas as pl
from jax.experimental.pallas import tpu as pltpu


def _round_up(n, m):
    return ((n + m - 1) // m) * m


def _recip(x):
    # EUP approx reciprocal + one Newton-Raphson step (~1e-6 relative error).
    r = pl.reciprocal(x, approx=True)
    return r * (2.0 - x * r)


def _distil_kernel(task_name, n_outs, x_ref, t_ref, m_ref, b1_ref, w2_ref,
                   b2_ref, out_ref):
    xT = x_ref[...]                            # [S, TB] int32 ids (batch on lanes)
    tT = t_ref[...].astype(jnp.float32)        # [S, TB] weights
    seq, tb = xT.shape
    voc = m_ref.shape[1]                       # m_ref = (emb @ w1).T  -> [H, V]

    # Fused gather + weighted mean, transposed:
    #   W_T[v, b] = (1/S) * sum_s T[b, s] * (x[b, s] == v)
    v_iota = jax.lax.broadcasted_iota(jnp.int32, (voc, tb), 0)
    w_acc = jnp.zeros((voc, tb), jnp.float32)
    for s in range(seq):                       # short static seq axis (S=8)
        w_acc = w_acc + jnp.where(xT[s:s + 1, :] == v_iota, tT[s:s + 1, :], 0.0)
    w_T = w_acc * jnp.float32(1.0 / seq)       # [V, TB]

    # h_T = ReLU(M_T @ W_T + b1_T)  with M = emb @ w1 folded in the wrapper.
    h = jnp.dot(m_ref[...], w_T, preferred_element_type=jnp.float32) + b1_ref[...]
    h = jnp.maximum(h, 0.0)                    # [H, TB]

    # head: logits_T = W2_T @ h_T + b2_T       [n_pad(=8), TB]
    logits = jnp.dot(w2_ref[...], h, preferred_element_type=jnp.float32) + b2_ref[...]

    row = jax.lax.broadcasted_iota(jnp.int32, logits.shape, 0)
    valid = row < n_outs                       # mask padded sublanes

    if task_name == "reg":
        out = logits
    elif task_name == "binary":
        out = jax.nn.sigmoid(logits)
    elif task_name == "multiclass":
        masked = jnp.where(valid, logits, jnp.float32(-1e30))
        m = jnp.max(masked, axis=0, keepdims=True)           # [1, TB] (sublane red.)
        e = jnp.where(valid, jnp.exp(masked - m), 0.0)
        out = e * _recip(jnp.sum(e, axis=0, keepdims=True))
    else:
        raise ValueError(task_name)

    out_ref[...] = out.astype(out_ref.dtype)


def distil_predictor_forward(x, T, params, task_name="multiclass", batch_tile=2048):
    """x: [B, S] int32 token ids, T: [B, S] float32 weights -> [B, n_outs]."""
    emb, w1, b1, w2, b2 = (params["emb"], params["w1"], params["b1"],
                           params["w2"], params["b2"])
    B, S = x.shape
    V, E = emb.shape
    H = w1.shape[1]
    n_outs = w2.shape[1]

    # Fold emb @ w1 once per call (tiny [V, H] matmul, full-precision).
    m_T = jnp.dot(emb, w1, precision=jax.lax.Precision.HIGHEST).T   # [H, V]
    b1_T = jnp.reshape(b1, (H, 1))                                  # [H, 1]

    # Head is emitted transposed: pad the output dim to one 8-row sublane group.
    n_pad = max(8, pl.cdiv(n_outs, 8) * 8)
    w2_T = jnp.zeros((n_pad, H), w2.dtype).at[:n_outs, :].set(w2.T)
    b2_T = jnp.zeros((n_pad, 1), b2.dtype).at[:n_outs, :].set(jnp.reshape(b2, (n_outs, 1)))

    # Batch on the lane axis: tiles are multiples of 128 lanes.
    tb = min(batch_tile, _round_up(B, 128))
    tb = max(128, (tb // 128) * 128)
    if pl.cdiv(B, tb) < 2 and B > 128:
        # Keep >=2 grid steps so the "parallel" axis can shard across 2 TCs (v7x).
        tb = max(128, _round_up(pl.cdiv(B, 2), 128))
    b_pad = pl.cdiv(B, tb) * tb

    # Transpose inputs so batch is the (lane-dense) minor axis; pad with token 0 /
    # weight 0 (padded columns are discarded in the final slice).
    xT = jnp.transpose(x)
    TT = jnp.transpose(T)
    if b_pad != B:
        xT = jnp.pad(xT, ((0, 0), (0, b_pad - B)))
        TT = jnp.pad(TT, ((0, 0), (0, b_pad - B)))

    grid = (b_pad // tb,)
    kernel = functools.partial(_distil_kernel, task_name, n_outs)

    cost = pl.CostEstimate(
        flops=2 * b_pad * (S * V + V * H + H * n_pad),
        transcendentals=0 if task_name == "reg" else b_pad * n_pad,
        bytes_accessed=(xT.size * 4 + TT.size * 4 + b_pad * n_pad * 4
                        + m_T.size * 4 + b1_T.size * 4 + w2_T.size * 4 + b2_T.size * 4),
    )

    out_t = pl.pallas_call(
        kernel,
        out_shape=jax.ShapeDtypeStruct((n_pad, b_pad), jnp.float32),
        grid_spec=pltpu.PrefetchScalarGridSpec(
            num_scalar_prefetch=0,
            grid=grid,
            in_specs=[
                pl.BlockSpec((S, tb), lambda i: (0, i)),         # xT   (streamed)
                pl.BlockSpec((S, tb), lambda i: (0, i)),         # TT   (streamed)
                pl.BlockSpec((H, V), lambda i: (0, 0)),          # M_T  (resident)
                pl.BlockSpec((H, 1), lambda i: (0, 0)),          # b1_T (resident)
                pl.BlockSpec((n_pad, H), lambda i: (0, 0)),      # w2_T (resident)
                pl.BlockSpec((n_pad, 1), lambda i: (0, 0)),      # b2_T (resident)
            ],
            out_specs=pl.BlockSpec((n_pad, tb), lambda i: (0, i)),
        ),
        compiler_params=pltpu.CompilerParams(
            dimension_semantics=("parallel",),   # 2 TCs on v7x; no-op elsewhere
        ),
        cost_estimate=cost,
    )(xT, TT, m_T, b1_T, w2_T, b2_T)

    return jnp.transpose(out_t[:n_outs, :B])


def init_params(key, voc_size, embed_dim, hidden_dim, n_outs):
    k_emb, k_w1, k_b1, k_w2, k_b2 = jax.random.split(key, 5)
    emb = jax.random.normal(k_emb, (voc_size, embed_dim), jnp.float32)
    lim1 = 1.0 / jnp.sqrt(embed_dim)
    w1 = jax.random.uniform(k_w1, (embed_dim, hidden_dim), jnp.float32, -lim1, lim1)
    b1 = jax.random.uniform(k_b1, (1, hidden_dim), jnp.float32, -lim1, lim1)
    lim2 = 1.0 / jnp.sqrt(hidden_dim)
    w2 = jax.random.uniform(k_w2, (hidden_dim, n_outs), jnp.float32, -lim2, lim2)
    b2 = jax.random.uniform(k_b2, (1, n_outs), jnp.float32, -lim2, lim2)
    return {"emb": emb, "w1": w1, "b1": b1, "w2": w2, "b2": b2}


if __name__ == "__main__":
    B, S = 2, 8
    voc_size, embed_dim, hidden_dim, n_outs = 50, 32, 16, 3
    task_name = "multiclass"

    key = jax.random.PRNGKey(0)
    k_params, k_x, k_t = jax.random.split(key, 3)

    params = init_params(k_params, voc_size, embed_dim, hidden_dim, n_outs)
    x = jax.random.randint(k_x, (B, S), 0, voc_size, dtype=jnp.int32)
    T = jax.random.uniform(k_t, (B, S), jnp.float32)

    out = distil_predictor_forward(x, T, params, task_name=task_name)
    out = jax.block_until_ready(out)

    # Reference check in plain JAX (same params / inputs).
    embed = jnp.take(params["emb"], x, axis=0)
    pooled = jnp.mean(embed * T[:, :, None], axis=1)
    h = jnp.maximum(pooled @ params["w1"] + params["b1"], 0.0)
    logits = h @ params["w2"] + params["b2"]
    ref = jax.nn.softmax(logits, axis=-1)
    assert out.shape == (B, n_outs)
    assert jnp.allclose(out, ref, atol=2e-5, rtol=2e-5)

    print("KERNEL_OK")
</pallas_src>

<mosaic_0001>
module attributes {stable_mosaic.version = 11 : i64} {
  func.func @_distil_kernel(%arg0: i32, %arg1: memref<8x128xi32, #tpu.memory_space<vmem>>, %arg2: memref<8x128xf32, #tpu.memory_space<vmem>>, %arg3: memref<16x50xf32, #tpu.memory_space<vmem>>, %arg4: memref<16x1xf32, #tpu.memory_space<vmem>>, %arg5: memref<8x16xf32, #tpu.memory_space<vmem>>, %arg6: memref<8x1xf32, #tpu.memory_space<vmem>>, %arg7: memref<8x128xf32, #tpu.memory_space<vmem>>) attributes {dimension_semantics = [#tpu.dimension_semantics<parallel>], iteration_bounds = array<i64: 1>, scalar_prefetch = 0 : i64, scratch_operands = 0 : i64, tpu.core_type = #tpu.core_type<tc>, window_params = [{transform_indices = @transform_0, window_bounds = array<i64: 8, 128>}, {transform_indices = @transform_1, window_bounds = array<i64: 8, 128>}, {pipeline_mode = #tpu.pipeline_mode<synchronous>, transform_indices = @transform_2, window_bounds = array<i64: 16, 50>}, {pipeline_mode = #tpu.pipeline_mode<synchronous>, transform_indices = @transform_3, window_bounds = array<i64: 16, 1>}, {pipeline_mode = #tpu.pipeline_mode<synchronous>, transform_indices = @transform_4, window_bounds = array<i64: 8, 16>}, {pipeline_mode = #tpu.pipeline_mode<synchronous>, transform_indices = @transform_5, window_bounds = array<i64: 8, 1>}, {transform_indices = @transform_6, window_bounds = array<i64: 8, 128>}]} {
    %c0 = arith.constant 0 : index
    %c0_0 = arith.constant 0 : index
    %0 = vector.load %arg1[%c0, %c0_0] : memref<8x128xi32, #tpu.memory_space<vmem>>, vector<8x128xi32>
    %c0_1 = arith.constant 0 : index
    %c0_2 = arith.constant 0 : index
    %1 = vector.load %arg2[%c0_1, %c0_2] : memref<8x128xf32, #tpu.memory_space<vmem>>, vector<8x128xf32>
    %2 = tpu.iota {dimensions = array<i32: 0>} : vector<50x128xi32>
    %cst = arith.constant 0.000000e+00 : f32
    %3 = vector.broadcast %cst : f32 to vector<50x128xf32>
    %4 = vector.extract_strided_slice %0 {offsets = [0, 0], sizes = [1, 128], strides = [1, 1]} : vector<8x128xi32> to vector<1x128xi32>
    %5 = vector.broadcast %4 : vector<1x128xi32> to vector<50x128xi32>
    %6 = arith.cmpi eq, %5, %2 : vector<50x128xi32>
    %7 = vector.extract_strided_slice %1 {offsets = [0, 0], sizes = [1, 128], strides = [1, 1]} : vector<8x128xf32> to vector<1x128xf32>
    %cst_3 = arith.constant 0.000000e+00 : f32
    %8 = vector.shape_cast %7 : vector<1x128xf32> to vector<1x128xf32>
    %9 = vector.broadcast %8 : vector<1x128xf32> to vector<50x128xf32>
    %10 = vector.broadcast %cst_3 : f32 to vector<50x128xf32>
    %11 = arith.select %6, %9, %10 : vector<50x128xi1>, vector<50x128xf32>
    %12 = arith.addf %3, %11 : vector<50x128xf32>
    %13 = vector.extract_strided_slice %0 {offsets = [1, 0], sizes = [1, 128], strides = [1, 1]} : vector<8x128xi32> to vector<1x128xi32>
    %14 = vector.broadcast %13 : vector<1x128xi32> to vector<50x128xi32>
    %15 = arith.cmpi eq, %14, %2 : vector<50x128xi32>
    %16 = vector.extract_strided_slice %1 {offsets = [1, 0], sizes = [1, 128], strides = [1, 1]} : vector<8x128xf32> to vector<1x128xf32>
    %cst_4 = arith.constant 0.000000e+00 : f32
    %17 = vector.shape_cast %16 : vector<1x128xf32> to vector<1x128xf32>
    %18 = vector.broadcast %17 : vector<1x128xf32> to vector<50x128xf32>
    %19 = vector.broadcast %cst_4 : f32 to vector<50x128xf32>
    %20 = arith.select %15, %18, %19 : vector<50x128xi1>, vector<50x128xf32>
    %21 = arith.addf %12, %20 : vector<50x128xf32>
    %22 = vector.extract_strided_slice %0 {offsets = [2, 0], sizes = [1, 128], strides = [1, 1]} : vector<8x128xi32> to vector<1x128xi32>
    %23 = vector.broadcast %22 : vector<1x128xi32> to vector<50x128xi32>
    %24 = arith.cmpi eq, %23, %2 : vector<50x128xi32>
    %25 = vector.extract_strided_slice %1 {offsets = [2, 0], sizes = [1, 128], strides = [1, 1]} : vector<8x128xf32> to vector<1x128xf32>
    %cst_5 = arith.constant 0.000000e+00 : f32
    %26 = vector.shape_cast %25 : vector<1x128xf32> to vector<1x128xf32>
    %27 = vector.broadcast %26 : vector<1x128xf32> to vector<50x128xf32>
    %28 = vector.broadcast %cst_5 : f32 to vector<50x128xf32>
    %29 = arith.select %24, %27, %28 : vector<50x128xi1>, vector<50x128xf32>
    %30 = arith.addf %21, %29 : vector<50x128xf32>
    %31 = vector.extract_strided_slice %0 {offsets = [3, 0], sizes = [1, 128], strides = [1, 1]} : vector<8x128xi32> to vector<1x128xi32>
    %32 = vector.broadcast %31 : vector<1x128xi32> to vector<50x128xi32>
    %33 = arith.cmpi eq, %32, %2 : vector<50x128xi32>
    %34 = vector.extract_strided_slice %1 {offsets = [3, 0], sizes = [1, 128], strides = [1, 1]} : vector<8x128xf32> to vector<1x128xf32>
    %cst_6 = arith.constant 0.000000e+00 : f32
    %35 = vector.shape_cast %34 : vector<1x128xf32> to vector<1x128xf32>
    %36 = vector.broadcast %35 : vector<1x128xf32> to vector<50x128xf32>
    %37 = vector.broadcast %cst_6 : f32 to vector<50x128xf32>
    %38 = arith.select %33, %36, %37 : vector<50x128xi1>, vector<50x128xf32>
    %39 = arith.addf %30, %38 : vector<50x128xf32>
    %40 = vector.extract_strided_slice %0 {offsets = [4, 0], sizes = [1, 128], strides = [1, 1]} : vector<8x128xi32> to vector<1x128xi32>
    %41 = vector.broadcast %40 : vector<1x128xi32> to vector<50x128xi32>
    %42 = arith.cmpi eq, %41, %2 : vector<50x128xi32>
    %43 = vector.extract_strided_slice %1 {offsets = [4, 0], sizes = [1, 128], strides = [1, 1]} : vector<8x128xf32> to vector<1x128xf32>
    %cst_7 = arith.constant 0.000000e+00 : f32
    %44 = vector.shape_cast %43 : vector<1x128xf32> to vector<1x128xf32>
    %45 = vector.broadcast %44 : vector<1x128xf32> to vector<50x128xf32>
    %46 = vector.broadcast %cst_7 : f32 to vector<50x128xf32>
    %47 = arith.select %42, %45, %46 : vector<50x128xi1>, vector<50x128xf32>
    %48 = arith.addf %39, %47 : vector<50x128xf32>
    %49 = vector.extract_strided_slice %0 {offsets = [5, 0], sizes = [1, 128], strides = [1, 1]} : vector<8x128xi32> to vector<1x128xi32>
    %50 = vector.broadcast %49 : vector<1x128xi32> to vector<50x128xi32>
    %51 = arith.cmpi eq, %50, %2 : vector<50x128xi32>
    %52 = vector.extract_strided_slice %1 {offsets = [5, 0], sizes = [1, 128], strides = [1, 1]} : vector<8x128xf32> to vector<1x128xf32>
    %cst_8 = arith.constant 0.000000e+00 : f32
    %53 = vector.shape_cast %52 : vector<1x128xf32> to vector<1x128xf32>
    %54 = vector.broadcast %53 : vector<1x128xf32> to vector<50x128xf32>
    %55 = vector.broadcast %cst_8 : f32 to vector<50x128xf32>
    %56 = arith.select %51, %54, %55 : vector<50x128xi1>, vector<50x128xf32>
    %57 = arith.addf %48, %56 : vector<50x128xf32>
    %58 = vector.extract_strided_slice %0 {offsets = [6, 0], sizes = [1, 128], strides = [1, 1]} : vector<8x128xi32> to vector<1x128xi32>
    %59 = vector.broadcast %58 : vector<1x128xi32> to vector<50x128xi32>
    %60 = arith.cmpi eq, %59, %2 : vector<50x128xi32>
    %61 = vector.extract_strided_slice %1 {offsets = [6, 0], sizes = [1, 128], strides = [1, 1]} : vector<8x128xf32> to vector<1x128xf32>
    %cst_9 = arith.constant 0.000000e+00 : f32
    %62 = vector.shape_cast %61 : vector<1x128xf32> to vector<1x128xf32>
    %63 = vector.broadcast %62 : vector<1x128xf32> to vector<50x128xf32>
    %64 = vector.broadcast %cst_9 : f32 to vector<50x128xf32>
    %65 = arith.select %60, %63, %64 : vector<50x128xi1>, vector<50x128xf32>
    %66 = arith.addf %57, %65 : vector<50x128xf32>
    %67 = vector.extract_strided_slice %0 {offsets = [7, 0], sizes = [1, 128], strides = [1, 1]} : vector<8x128xi32> to vector<1x128xi32>
    %68 = vector.broadcast %67 : vector<1x128xi32> to vector<50x128xi32>
    %69 = arith.cmpi eq, %68, %2 : vector<50x128xi32>
    %70 = vector.extract_strided_slice %1 {offsets = [7, 0], sizes = [1, 128], strides = [1, 1]} : vector<8x128xf32> to vector<1x128xf32>
    %cst_10 = arith.constant 0.000000e+00 : f32
    %71 = vector.shape_cast %70 : vector<1x128xf32> to vector<1x128xf32>
    %72 = vector.broadcast %71 : vector<1x128xf32> to vector<50x128xf32>
    %73 = vector.broadcast %cst_10 : f32 to vector<50x128xf32>
    %74 = arith.select %69, %72, %73 : vector<50x128xi1>, vector<50x128xf32>
    %75 = arith.addf %66, %74 : vector<50x128xf32>
    %cst_11 = arith.constant 1.250000e-01 : f32
    %76 = vector.broadcast %cst_11 : f32 to vector<50x128xf32>
    %77 = arith.mulf %75, %76 : vector<50x128xf32>
    %c0_12 = arith.constant 0 : index
    %c0_13 = arith.constant 0 : index
    %78 = vector.load %arg3[%c0_12, %c0_13] : memref<16x50xf32, #tpu.memory_space<vmem>>, vector<16x50xf32>
    %cst_14 = arith.constant dense<0.000000e+00> : vector<16x128xf32>
    %79 = tpu.matmul %78, %77, %cst_14 {dimension_numbers = #tpu.dot_dimension_numbers<[1], [0], [0], [1], [0, 0, 1, 1], [], []>} : vector<16x50xf32>, vector<50x128xf32>, vector<16x128xf32> -> vector<16x128xf32>
    %c0_15 = arith.constant 0 : index
    %c0_16 = arith.constant 0 : index
    %80 = vector.load %arg4[%c0_15, %c0_16] : memref<16x1xf32, #tpu.memory_space<vmem>>, vector<16x1xf32>
    %81 = vector.broadcast %80 : vector<16x1xf32> to vector<16x128xf32>
    %82 = arith.addf %79, %81 : vector<16x128xf32>
    %cst_17 = arith.constant 0.000000e+00 : f32
    %83 = vector.broadcast %cst_17 : f32 to vector<16x128xf32>
    %84 = arith.maximumf %82, %83 : vector<16x128xf32>
    %c0_18 = arith.constant 0 : index
    %c0_19 = arith.constant 0 : index
    %85 = vector.load %arg5[%c0_18, %c0_19] : memref<8x16xf32, #tpu.memory_space<vmem>>, vector<8x16xf32>
    %cst_20 = arith.constant dense<0.000000e+00> : vector<8x128xf32>
    %86 = tpu.matmul %85, %84, %cst_20 {dimension_numbers = #tpu.dot_dimension_numbers<[1], [0], [0], [1], [0, 0, 1, 1], [], []>} : vector<8x16xf32>, vector<16x128xf32>, vector<8x128xf32> -> vector<8x128xf32>
    %c0_21 = arith.constant 0 : index
    %c0_22 = arith.constant 0 : index
    %87 = vector.load %arg6[%c0_21, %c0_22] : memref<8x1xf32, #tpu.memory_space<vmem>>, vector<8x1xf32>
    %88 = vector.broadcast %87 : vector<8x1xf32> to vector<8x128xf32>
    %89 = arith.addf %86, %88 : vector<8x128xf32>
    %90 = tpu.iota {dimensions = array<i32: 0>} : vector<8x128xi32>
    %c3_i32 = arith.constant 3 : i32
    %91 = vector.broadcast %c3_i32 : i32 to vector<8x128xi32>
    %92 = arith.cmpi slt, %90, %91 : vector<8x128xi32>
    %cst_23 = arith.constant -1.000000e+30 : f32
    %93 = vector.broadcast %cst_23 : f32 to vector<8x128xf32>
    %94 = arith.select %92, %89, %93 : vector<8x128xi1>, vector<8x128xf32>
    %cst_24 = arith.constant dense<0xFF800000> : vector<128xf32>
    %95 = vector.multi_reduction <maximumf>, %94, %cst_24 [0] : vector<8x128xf32> to vector<128xf32>
    %96 = vector.shape_cast %95 : vector<128xf32> to vector<1x128xf32>
    %97 = vector.broadcast %96 : vector<1x128xf32> to vector<8x128xf32>
    %98 = arith.subf %94, %97 : vector<8x128xf32>
    %99 = math.exp %98 : vector<8x128xf32>
    %cst_25 = arith.constant 0.000000e+00 : f32
    %100 = vector.broadcast %cst_25 : f32 to vector<8x128xf32>
    %101 = arith.select %92, %99, %100 : vector<8x128xi1>, vector<8x128xf32>
    %cst_26 = arith.constant dense<0.000000e+00> : vector<128xf32>
    %102 = vector.multi_reduction <add>, %101, %cst_26 [0] : vector<8x128xf32> to vector<128xf32>
    %103 = vector.shape_cast %102 : vector<128xf32> to vector<1x128xf32>
    %104 = tpu.reciprocal %103 {approx = true} : vector<1x128xf32> -> vector<1x128xf32>
    %105 = arith.mulf %103, %104 : vector<1x128xf32>
    %cst_27 = arith.constant 2.000000e+00 : f32
    %106 = vector.broadcast %cst_27 : f32 to vector<1x128xf32>
    %107 = arith.subf %106, %105 : vector<1x128xf32>
    %108 = arith.mulf %104, %107 : vector<1x128xf32>
    %109 = vector.broadcast %108 : vector<1x128xf32> to vector<8x128xf32>
    %110 = arith.mulf %101, %109 : vector<8x128xf32>
    %c0_28 = arith.constant 0 : index
    %c0_29 = arith.constant 0 : index
    %111 = vector.load %arg7[%c0_28, %c0_29] : memref<8x128xf32, #tpu.memory_space<vmem>>, vector<8x128xf32>
    tpu.vector_store %arg7[%c0_28, %c0_29], %110 {strides = array<i32>} : memref<8x128xf32, #tpu.memory_space<vmem>>, vector<8x128xf32>,
    return
  }
  func.func @transform_0(%arg0: i32) -> (i32, i32) {
    %c0_i32 = arith.constant 0 : i32
    %c0_i32_0 = arith.constant 0 : i32
    return %c0_i32, %arg0 : i32, i32
  }
  func.func @transform_1(%arg0: i32) -> (i32, i32) {
    %c0_i32 = arith.constant 0 : i32
    %c0_i32_0 = arith.constant 0 : i32
    return %c0_i32, %arg0 : i32, i32
  }
  func.func @transform_2(%arg0: i32) -> (i32, i32) {
    %c0_i32 = arith.constant 0 : i32
    %c0_i32_0 = arith.constant 0 : i32
    %c0_i32_1 = arith.constant 0 : i32
    return %c0_i32, %c0_i32_0 : i32, i32
  }
  func.func @transform_3(%arg0: i32) -> (i32, i32) {
    %c0_i32 = arith.constant 0 : i32
    %c0_i32_0 = arith.constant 0 : i32
    %c0_i32_1 = arith.constant 0 : i32
    return %c0_i32, %c0_i32_0 : i32, i32
  }
  func.func @transform_4(%arg0: i32) -> (i32, i32) {
    %c0_i32 = arith.constant 0 : i32
    %c0_i32_0 = arith.constant 0 : i32
    %c0_i32_1 = arith.constant 0 : i32
    return %c0_i32, %c0_i32_0 : i32, i32
  }
  func.func @transform_5(%arg0: i32) -> (i32, i32) {
    %c0_i32 = arith.constant 0 : i32
    %c0_i32_0 = arith.constant 0 : i32
    %c0_i32_1 = arith.constant 0 : i32
    return %c0_i32, %c0_i32_0 : i32, i32
  }
  func.func @transform_6(%arg0: i32) -> (i32, i32) {
    %c0_i32 = arith.constant 0 : i32
    %c0_i32_0 = arith.constant 0 : i32
    return %c0_i32, %arg0 : i32, i32
  }
}

</mosaic_0001>

<bundles_post_ra>
// kernel: tpu_custom_call.1
= control target key start
LH: loop header
LB: loop body
LE: loop exit
PB: predicated region body
PF: predicated region fallthrough
CT: control target
= control target key end

     0   :  { %v26_v0 = vlaneseq  ;;  %vm287_vm0 = vcmask 408576   ;;  %v584_v2 = vmov 0   ;;  %s871_s0 = inlined_call_operand.vmem [shape: s32[8,128], index: 0, kind: input, shape index: {}]   ;;  %s872_s1 = inlined_call_operand.vmem [shape: f32[8,128], index: 1, kind: input, shape index: {}]   ;;  %s873_s2 = inlined_call_operand.vmem [shape: f32[16,50], index: 2, kind: input, shape index: {}]   ;;  %s874_s3 = inlined_call_operand.vmem [shape: f32[16,1], index: 3, kind: input, shape index: {}]   ;;  %s875_s4 = inlined_call_operand.vmem [shape: f32[8,16], index: 4, kind: input, shape index: {}]   ;;  %s876_s5 = inlined_call_operand.vmem [shape: f32[8,1], index: 5, kind: input, shape index: {}]   ;;  %s877_s6 = inlined_call_operand.hbm [shape: f32[8,128], index: 6, kind: output, shape index: {}]  }
   0x1   :  { %v273_v1 = vld [vmem:[%s873_s2] sm:$0xff]  ;;  %554 = vset.pattern.permute.xlu0 %v584_v2  ;;  %555 = vset.pattern.permute.xlu1 %v584_v2 }
   0x2   :  { %524 = vmatprep.mubr.msk.f32.mxu0 %vm287_vm0, %v273_v1  ;;  %v275_v3 = vld [vmem:[%s874_s3] sm:$0xff]  ;;  %v631_v4 = vshrl.u32 %v26_v0, 7 }
   0x3   :  { %279 = vperm.xlu0 %554, %v275_v3  }
   0x4   :  { %11 = vsyncpa [#allocation3], 0  ;;  %v636_v5 = vld [vmem:[%s871_s0] sm:$0xff]  ;;  %v276_v7 = vld [vmem:[%s874_s3 + $0x8] sm:$0xff]  ;;  %v647_v8 = vadd.s32 8, %v631_v4  ;;  %v36_v9 = vsub.s32 0, %v631_v4 }
   0x5   :  { %v641_v6 = vld [vmem:[%s872_s1] sm:$0xff]  ;;  %v65_v10 = vsub.s32 1, %v631_v4  ;;  %v94_v11 = vsub.s32 2, %v631_v4  ;;  %v123_v12 = vsub.s32 3, %v631_v4  ;;  %v152_v13 = vsub.s32 4, %v631_v4 }
   0x6   :  { %v181_v14 = vsub.s32 5, %v631_v4  ;;  %v210_v15 = vsub.s32 6, %v631_v4  ;;  %v657_v16 = vrot.slane %v636_v5, %v36_v9  ;;  %v660_v17 = vrot.slane %v641_v6, %v36_v9 }
   0x7   :  { %v663_v18 = vrot.slane %v636_v5, %v65_v10  ;;  %v666_v19 = vrot.slane %v641_v6, %v65_v10  ;;  %284 = vperm.xlu0 %554, %v276_v7   ;;  %v669_v20 = vrot.slane %v636_v5, %v94_v11  ;;  %v672_v21 = vrot.slane %v641_v6, %v94_v11 }
   0x8   :  { %v675_v22 = vrot.slane %v636_v5, %v123_v12  ;;  %v678_v23 = vrot.slane %v641_v6, %v123_v12  ;;  %vm38_vm1 = vcmp.eq.s32.totalorder %v657_v16, %v631_v4  ;;  %vm39_vm2 = vcmp.eq.s32.totalorder %v657_v16, %v647_v8 }
   0x9   :  { %vm67_vm3 = vcmp.eq.s32.totalorder %v663_v18, %v631_v4  ;;  %vm68_vm4 = vcmp.eq.s32.totalorder %v663_v18, %v647_v8  ;;  %v49_v24 = vsel %vm38_vm1, %v660_v17, 0.0  ;;  %v50_v25 = vsel %vm39_vm2, %v660_v17, 0.0 }
   0xa   :  { %v78_v26 = vsel %vm67_vm3, %v666_v19, 0.0  ;;  %v79_v27 = vsel %vm68_vm4, %v666_v19, 0.0  ;;  %vm96_vm5 = vcmp.eq.s32.totalorder %v669_v20, %v631_v4  ;;  %vm97_vm6 = vcmp.eq.s32.totalorder %v669_v20, %v647_v8 }
   0xb   :  { %v85_v28 = vadd.f32 %v78_v26, %v49_v24  ;;  %v86_v29 = vadd.f32 %v79_v27, %v50_v25  ;;  %v107_v30 = vsel %vm96_vm5, %v672_v21, 0.0  ;;  %v108_v31 = vsel %vm97_vm6, %v672_v21, 0.0 }
   0xc   :  { %vm125_vm7 = vcmp.eq.s32.totalorder %v675_v22, %v631_v4  ;;  %vm126_vm8 = vcmp.eq.s32.totalorder %v675_v22, %v647_v8  ;;  %v705_v36 = vrot.slane %v636_v5, %v152_v13  ;;  %v708_v37 = vrot.slane %v641_v6, %v152_v13 }
   0xd   :  { %v114_v32 = vadd.f32 %v107_v30, %v85_v28  ;;  %v115_v33 = vadd.f32 %v108_v31, %v86_v29  ;;  %v136_v34 = vsel %vm125_vm7, %v678_v23, 0.0  ;;  %v137_v35 = vsel %vm126_vm8, %v678_v23, 0.0 }
   0xe   :  { %v711_v38 = vrot.slane %v636_v5, %v181_v14  ;;  %v714_v39 = vrot.slane %v641_v6, %v181_v14  ;;  %v717_v42 = vrot.slane %v636_v5, %v210_v15  ;;  %v720_v43 = vrot.slane %v641_v6, %v210_v15 }
   0xf   :  { %v143_v40 = vadd.f32 %v136_v34, %v114_v32  ;;  %v144_v41 = vadd.f32 %v137_v35, %v115_v33  ;;  %vm154_vm9 = vcmp.eq.s32.totalorder %v705_v36, %v631_v4  ;;  %vm155_vm10 = vcmp.eq.s32.totalorder %v705_v36, %v647_v8 }
  0x10   :  { %vm183_vm11 = vcmp.eq.s32.totalorder %v711_v38, %v631_v4  ;;  %vm184_vm12 = vcmp.eq.s32.totalorder %v711_v38, %v647_v8  ;;  %v165_v44 = vsel %vm154_vm9, %v708_v37, 0.0  ;;  %v166_v45 = vsel %vm155_vm10, %v708_v37, 0.0 }
  0x11   :  { %v194_v46 = vsel %vm183_vm11, %v714_v39, 0.0  ;;  %v195_v47 = vsel %vm184_vm12, %v714_v39, 0.0  ;;  %v172_v48 = vadd.f32 %v165_v44, %v143_v40  ;;  %v173_v49 = vadd.f32 %v166_v45, %v144_v41 }
  0x12   :  { %vm212_vm13 = vcmp.eq.s32.totalorder %v717_v42, %v631_v4  ;;  %vm213_vm14 = vcmp.eq.s32.totalorder %v717_v42, %v647_v8  ;;  %v239_v52 = vsub.s32 7, %v631_v4  ;;  %v29_v53 = vadd.s32 16, %v631_v4 }
  0x13   :  { %v223_v50 = vsel %vm212_vm13, %v720_v43, 0.0  ;;  %v224_v51 = vsel %vm213_vm14, %v720_v43, 0.0  ;;  %v201_v54 = vadd.f32 %v194_v46, %v172_v48  ;;  %v202_v55 = vadd.f32 %v195_v47, %v173_v49 }
  0x14   :  { %v30_v56 = vadd.s32 24, %v631_v4  ;;  %v744_v57 = vadd.s32 32, %v631_v4  ;;  %v747_v58 = vrot.slane %v636_v5, %v239_v52  ;;  %v750_v59 = vrot.slane %v641_v6, %v239_v52 }
  0x15   :  { %vm40_vm15 = vcmp.eq.s32.totalorder %v657_v16, %v29_v53  ;;  %vm69_vm1 = vcmp.eq.s32.totalorder %v663_v18, %v29_v53  ;;  %v230_v60 = vadd.f32 %v223_v50, %v201_v54  ;;  %v231_v61 = vadd.f32 %v224_v51, %v202_v55 }
  0x16   :  { %vm41_vm2 = vcmp.eq.s32.totalorder %v657_v16, %v30_v56  ;;  %v51_v62 = vsel %vm40_vm15, %v660_v17, 0.0  ;;  %vm241_vm3 = vcmp.eq.s32.totalorder %v747_v58, %v631_v4  ;;  %vm242_vm4 = vcmp.eq.s32.totalorder %v747_v58, %v647_v8 }
  0x17   :  { %v52_v63 = vsel %vm41_vm2, %v660_v17, 0.0  ;;  %vm70_vm5 = vcmp.eq.s32.totalorder %v663_v18, %v30_v56  ;;  %v252_v0 = vsel %vm241_vm3, %v750_v59, 0.0  ;;  %v253_v1 = vsel %vm242_vm4, %v750_v59, 0.0 }
  0x18   :  { %v80_v2 = vsel %vm69_vm1, %v666_v19, 0.0  ;;  %v81_v3 = vsel %vm70_vm5, %v666_v19, 0.0  ;;  %v259_v5 = vadd.f32 %v252_v0, %v230_v60  ;;  %v260_v6 = vadd.f32 %v253_v1, %v231_v61 }
  0x19   :  { %v87_v7 = vadd.f32 %v80_v2, %v51_v62  ;;  %v88_v9 = vadd.f32 %v81_v3, %v52_v63  ;;  %vm98_vm6 = vcmp.eq.s32.totalorder %v669_v20, %v29_v53  ;;  %vm99_vm7 = vcmp.eq.s32.totalorder %v669_v20, %v30_v56 }
  0x1a   :  { %vm127_vm8 = vcmp.eq.s32.totalorder %v675_v22, %v29_v53  ;;  %vm128_vm9 = vcmp.eq.s32.totalorder %v675_v22, %v30_v56  ;;  %v266_v8 = vmul.f32 0.125, %v259_v5  ;;  %v267_v10 = vmul.f32 0.125, %v260_v6 }
  0x1b   :  { %v109_v11 = vsel %vm98_vm6, %v672_v21, 0.0  ;;  %v110_v12 = vsel %vm99_vm7, %v672_v21, 0.0  ;;  %v138_v15 = vsel %vm127_vm8, %v678_v23, 0.0  ;;  %v139_v24 = vsel %vm128_vm9, %v678_v23, 0.0 }
  0x1c   :  { %v116_v13 = vadd.f32 %v109_v11, %v87_v7  ;;  %v117_v14 = vadd.f32 %v110_v12, %v88_v9  ;;  %v534_v25 = vpack.c.bf16 %v267_v10, %v266_v8  ;;  %vm156_vm10 = vcmp.eq.s32.totalorder %v705_v36, %v29_v53 }
  0x1d   :  { %vm157_vm11 = vcmp.eq.s32.totalorder %v705_v36, %v30_v56  ;;  %vm185_vm12 = vcmp.eq.s32.totalorder %v711_v38, %v29_v53  ;;  %v167_v28 = vsel %vm156_vm10, %v708_v37, 0.0  ;;  %vm186_vm13 = vcmp.eq.s32.totalorder %v711_v38, %v30_v56 }
  0x1e   :  { %v145_v26 = vadd.f32 %v138_v15, %v116_v13  ;;  %v146_v27 = vadd.f32 %v139_v24, %v117_v14  ;;  %v168_v29 = vsel %vm157_vm11, %v708_v37, 0.0  ;;  %535 = vmatprep.subr.bf16.mxu0 %v534_v25  ;;  %v196_v30 = vsel %vm185_vm12, %v714_v39, 0.0 }
  0x1f   :  { %vm214_vm14 = vcmp.eq.s32.totalorder %v717_v42, %v29_v53  ;;  %vm215_vm15 = vcmp.eq.s32.totalorder %v717_v42, %v30_v56  ;;  %537 = vmatpush3.bf16.msra.mxu0 %v534_v25  ;;  %v197_v33 = vsel %vm186_vm13, %v714_v39, 0.0  ;;  %vm243_vm1 = vcmp.eq.s32.totalorder %v747_v58, %v29_v53 }
  0x20   :  { %v174_v31 = vadd.f32 %v167_v28, %v145_v26  ;;  %v175_v32 = vadd.f32 %v168_v29, %v146_v27  ;;  %v225_v34 = vsel %vm214_vm14, %v720_v43, 0.0  ;;  %v226_v35 = vsel %vm215_vm15, %v720_v43, 0.0 }
  0x21   :  { %vm244_vm2 = vcmp.eq.s32.totalorder %v747_v58, %v30_v56  ;;  %v32_v40 = vadd.s32 40, %v631_v4  ;;  %v254_v45 = vsel %vm243_vm1, %v750_v59, 0.0  ;;  %vm42_vm3 = vcmp.eq.s32.totalorder %v657_v16, %v744_v57 }
  0x22   :  { %v203_v41 = vadd.f32 %v196_v30, %v174_v31  ;;  %v204_v44 = vadd.f32 %v197_v33, %v175_v32  ;;  %v255_v46 = vsel %vm244_vm2, %v750_v59, 0.0  ;;  %vm71_vm5 = vcmp.eq.s32.totalorder %v663_v18, %v744_v57 }
  0x23   :  { %vm43_vm4 = vcmp.eq.s32.totalorder %v657_v16, %v32_v40  ;;  %vm72_vm6 = vcmp.eq.s32.totalorder %v663_v18, %v32_v40  ;;  %v53_v49 = vsel %vm42_vm3, %v660_v17, 0.0  ;;  %v82_v51 = vsel %vm71_vm5, %v666_v19, 0.0 }
  0x24   :  { %v232_v47 = vadd.f32 %v225_v34, %v203_v41  ;;  %v233_v48 = vadd.f32 %v226_v35, %v204_v44  ;;  %v54_v50 = vsel %vm43_vm4, %v660_v17, 0.0  ;;  %v83_v52 = vsel %vm72_vm6, %v666_v19, 0.0 }
  0x25   :  { %vm100_vm7 = vcmp.eq.s32.totalorder %v669_v20, %v744_v57  ;;  %vm101_vm8 = vcmp.eq.s32.totalorder %v669_v20, %v32_v40  ;;  %v89_v55 = vadd.f32 %v82_v51, %v53_v49  ;;  %v90_v56 = vadd.f32 %v83_v52, %v54_v50 }
  0x26   :  { %v261_v53 = vadd.f32 %v254_v45, %v232_v47  ;;  %v262_v54 = vadd.f32 %v255_v46, %v233_v48  ;;  %v111_v60 = vsel %vm100_vm7, %v672_v21, 0.0  ;;  %v112_v61 = vsel %vm101_vm8, %v672_v21, 0.0 }
  0x27   :  { %vm129_vm9 = vcmp.eq.s32.totalorder %v675_v22, %v744_v57  ;;  %vm130_vm10 = vcmp.eq.s32.totalorder %v675_v22, %v32_v40  ;;  %v118_v0 = vadd.f32 %v111_v60, %v89_v55  ;;  %v119_v1 = vadd.f32 %v112_v61, %v90_v56 }
  0x28   :  { %v268_v62 = vmul.f32 0.125, %v261_v53  ;;  %v269_v63 = vmul.f32 0.125, %v262_v54  ;;  %v140_v2 = vsel %vm129_vm9, %v678_v23, 0.0  ;;  %v141_v3 = vsel %vm130_vm10, %v678_v23, 0.0  ;;  %v375_v54 = vld [vmem:[%s875_s4] sm:$0xff]  ;;  %s588_s4 = smov [#allocation2]  }
  0x29   :  { %vm158_vm11 = vcmp.eq.s32.totalorder %v705_v36, %v744_v57  ;;  %vm159_vm12 = vcmp.eq.s32.totalorder %v705_v36, %v32_v40  ;;  %v147_v6 = vadd.f32 %v140_v2, %v118_v0  ;;  %v148_v7 = vadd.f32 %v141_v3, %v119_v1 }
  0x2a   :  { %v538_v5 = vpack.c.bf16 %v269_v63, %v268_v62  ;;  %v169_v9 = vsel %vm158_vm11, %v708_v37, 0.0  ;;  %v170_v8 = vsel %vm159_vm12, %v708_v37, 0.0  ;;  %vm187_vm13 = vcmp.eq.s32.totalorder %v711_v38, %v744_v57 }
  0x2b   :  { %vm188_vm14 = vcmp.eq.s32.totalorder %v711_v38, %v32_v40  ;;  %vm216_vm15 = vcmp.eq.s32.totalorder %v717_v42, %v744_v57  ;;  %v176_v10 = vadd.f32 %v169_v9, %v147_v6  ;;  %v177_v11 = vadd.f32 %v170_v8, %v148_v7 }
  0x2c   :  { %539 = vmatprep.subr.bf16.mxu0 %v538_v5  ;;  %v198_v12 = vsel %vm187_vm13, %v714_v39, 0.0  ;;  %v199_v13 = vsel %vm188_vm14, %v714_v39, 0.0  ;;  %vm217_vm1 = vcmp.eq.s32.totalorder %v717_v42, %v32_v40  ;;  %v227_v14 = vsel %vm216_vm15, %v720_v43, 0.0 }
  0x2d   :  { %541 = vmatpush3.bf16.msra.mxu0 %v538_v5  ;;  %vm245_vm2 = vcmp.eq.s32.totalorder %v747_v58, %v744_v57  ;;  %vm246_vm3 = vcmp.eq.s32.totalorder %v747_v58, %v32_v40  ;;  %v205_v15 = vadd.f32 %v198_v12, %v176_v10  ;;  %v206_v24 = vadd.f32 %v199_v13, %v177_v11 }
  0x2e   :  { %v228_v25 = vsel %vm217_vm1, %v720_v43, 0.0  ;;  %v256_v26 = vsel %vm245_vm2, %v750_v59, 0.0  ;;  %v257_v27 = vsel %vm246_vm3, %v750_v59, 0.0  ;;  %v33_v28 = vadd.s32 48, %v631_v4 }
  0x2f   :  { %v234_v29 = vadd.f32 %v227_v14, %v205_v15  ;;  %v235_v30 = vadd.f32 %v228_v25, %v206_v24  ;;  %vm294_vm12 = vcmask 1041408   ;;  %vm586_vm13 = vmmov 0  }
  0x30   :  { %vm44_vm4 = vcmp.eq.s32.totalorder %v657_v16, %v33_v28  ;;  %vm73_vm5 = vcmp.eq.s32.totalorder %v663_v18, %v33_v28  ;;  %vm102_vm6 = vcmp.eq.s32.totalorder %v669_v20, %v33_v28  ;;  %vm131_vm7 = vcmp.eq.s32.totalorder %v675_v22, %v33_v28 }
  0x31   :  { %v263_v57 = vadd.f32 %v256_v26, %v234_v29  ;;  %v264_v31 = vadd.f32 %v257_v27, %v235_v30  ;;  %v55_v32 = vsel %vm44_vm4, %v660_v17, 0.0  ;;  %v84_v33 = vsel %vm73_vm5, %v666_v19, 0.0 }
  0x32   :  { %v91_v34 = vadd.f32 %v84_v33, %v55_v32  ;;  %v113_v35 = vsel %vm102_vm6, %v672_v21, 0.0  ;;  %vm160_vm8 = vcmp.eq.s32.totalorder %v705_v36, %v33_v28  ;;  %v142_v16 = vsel %vm131_vm7, %v678_v23, 0.0 }
  0x33   :  { %v270_v40 = vmul.f32 0.125, %v263_v57  ;;  %v271_v41 = vmul.f32 0.125, %v264_v31  ;;  %vm189_vm9 = vcmp.eq.s32.totalorder %v711_v38, %v33_v28  ;;  %v171_v22 = vsel %vm160_vm8, %v708_v37, 0.0  ;;  %v274_v37 = vld [vmem:[%s873_s2 + $0x8] sm:$0xff] }
  0x34   :  { %v120_v18 = vadd.f32 %v113_v35, %v91_v34  ;;  %vm218_vm10 = vcmp.eq.s32.totalorder %v717_v42, %v33_v28  ;;  %v200_v17 = vsel %vm189_vm9, %v714_v39, 0.0  ;;  %vm247_vm11 = vcmp.eq.s32.totalorder %v747_v58, %v33_v28 }
  0x35   :  { %v542_v20 = vpack.c.bf16 %v271_v41, %v270_v40  ;;  %v229_v21 = vsel %vm218_vm10, %v720_v43, 0.0  ;;  %v258_v23 = vsel %vm247_vm11, %v750_v59, 0.0  ;;  %v585_v39 = vmov 0.0|0.0   ;;  %v376_v43 = vld [vmem:[%s876_s5] sm:$0xff]  ;;  %s486_s5 = sshll.u32 %s588_s4, 4  ;;  %s487_s5 = int_to_ptr.vmem [resolvable:$true] %s486_s5 }
  0x36   :  { %v149_v44 = vadd.f32 %v142_v16, %v120_v18  ;;  %546 = vmatprep.subr.bf16.mxu1 %v585_v39  ;;  %v587_v42 = vmov 0.0   ;;  %379 = vperm.xlu1 %555, %v376_v43   ;;  %vm456_vm14 = vcmp.lt.s32.totalorder %v631_v4, 3  ;;  %s560_s9 = scalar_lea.vmem %s487_s5, 128  ;;  %p565_p1 = scmp.lt.s32.totalorder %s487_s5, %s487_s5 }
  0x37   :  { %543 = vmatprep.subr.bf16.mxu0 %v542_v20  ;;  %531 = vmatprep.mubr.msk.f32.mxu1 %vm586_vm13, %v587_v42  ;;  %p561_p0 = scmp.ne.s32.totalorder %s487_s5, %s560_s9  ;;  %p566_p2 = scmp.lt.s32.totalorder %s560_s9, %s560_s9 }
  0x38   :  { %545 = vmatpush3.bf16.msra.mxu0 %v542_v20  ;;  %v178_v19 = vadd.f32 %v171_v22, %v149_v44 }
  0x39   :  { %p567_p3 = por %p566_p2, %p565_p1 }
  0x3a   :  { %v207_v36 = vadd.f32 %v200_v17, %v178_v19 }
  0x3b   :  { %p568_p4 = pnand %p567_p3, %p561_p0 }
  0x3c   :  { %v236_v45 = vadd.f32 %v229_v21, %v207_v36 }
  0x3e   :  { %v265_v38 = vadd.f32 %v258_v23, %v236_v45 }
  0x40   :  { %v272_v46 = vmul.f32 0.125, %v265_v38 }
  0x42   :  { %522 = vmatprep.subr.msk.mxu0 %vm294_vm12, %v272_v46 }
  0x43   :  { %523 = vmatpush3.msk.msra.mxu0 %vm294_vm12, %v272_v46 }
  0x44   :  { %525 = vmatmul.mubr.msk.f32.vlgmr.msra.gmra.mrb[0].mxu0 %vm287_vm0, %v274_v37  ;;  %vm382_vm0 = vcmask 130048  }
  0x82   :  { %v280_v58 = vpop.permute.xlu0 %279 }
  0x86   :  { %v285_v59 = vpop.permute.xlu0 %284 }
  0xb5   :  { %v380_v55 = vpop.permute.xlu1 %379 }
 0x117   :  { %v526_v47 = vpop.f32.mrb[0].mxu0 }
 0x118   :  { %v370_v48 = vadd.f32 %v526_v47, %v285_v59  ;;  %v364_v49 = vpop.f32.mrb[1].mxu0 }
 0x119   :  { %v365_v50 = vadd.f32 %v364_v49, %v280_v58 }
 0x11a   :  { %v374_v51 = vmax.f32 %v370_v48, 0.0 }
 0x11b   :  { %v373_v52 = vmax.f32 %v365_v50, 0.0 }
 0x11d   :  { %v547_v53 = vpack.c.bf16 %v374_v51, %v373_v52 }
 0x11f   :  { %548 = vmatpush3.bf16.msra.mxu1 %v547_v53 }
 0x122   :  { %532 = vmatmul.mubr.msk.f32.vlgmr.msra.gmra.mrb[0].mxu1 %vm382_vm0, %v375_v54 }
 0x1f5   :  { %v452_v56 = vpop.f32.mrb[0].mxu1 }
 0x1f6   :  { %v453_v60 = vadd.f32 %v452_v56, %v380_v55  ;;  %v533_v61 = vpop.f32.mrb[1].mxu1 }
 0x1f8   :  { %v457_v62 = vsel %vm456_vm14, %v453_v60, -1e+30 }
 0x1f9   :  { %v458_v63 = vrot.slane %v457_v62, 4 }
 0x1fb   :  { %v459_v0 = vmax.f32 %v457_v62, %v458_v63 }
 0x1fd   :  { %v460_v1 = vrot.slane %v459_v0, 2 }
 0x1ff   :  { %v461_v2 = vmax.f32 %v459_v0, %v460_v1 }
 0x201   :  { %v462_v3 = vrot.slane %v461_v2, 1 }
 0x203   :  { %v463_v5 = vmax.f32 %v461_v2, %v462_v3 }
 0x205   :  { %v464_v6 = vsub.f32 %v457_v62, %v463_v5 }
 0x207   :  { %v465_v7 = vmul.f32 1.442695, %v464_v6 }
 0x209   :  { %556 = vpow2.f32 %v465_v7 }
 0x213   :  { %v557_v9 = vpop.eup %556 }
 0x214   :  { %v467_v8 = vsel %vm456_vm14, %v557_v9, 0.0 }
 0x215   :  { %v468_v10 = vrot.slane %v467_v8, 4 }
 0x217   :  { %v469_v11 = vadd.f32 %v468_v10, %v467_v8 }
 0x219   :  { %v470_v12 = vrot.slane %v469_v11, 2 }
 0x21b   :  { %v471_v13 = vadd.f32 %v470_v12, %v469_v11 }
 0x21d   :  { %v472_v14 = vrot.slane %v471_v13, 1 }
 0x21f   :  { %v473_v4 = vadd.f32 %v472_v14, %v471_v13 }
 0x221   :  { %558 = vrcp.f32 %v473_v4 }
 0x22b   :  { %v559_v15 = vpop.eup %558 }
 0x22c   :  { %v475_v24 = vmul.f32 %v559_v15, %v473_v4 }
 0x22e   :  { %v476_v25 = vsub.f32 2.0, %v475_v24 }
 0x230   :  { %v477_v26 = vmul.f32 %v559_v15, %v476_v25 }
 0x232   :  { %v478_v27 = vmul.f32 %v477_v26, %v467_v8 }
 0x234   :  { %479 = vst [vmem:[#allocation2] sm:$0xff] %v478_v27 }
 0x235   :  { %571 = shalt.err (!%p568_p4)
}
 0x236   :  { %s572_s12 = scalar_lea.hbm %s877_s6, 128 }
 0x237   :  { %p573_p5 = scmp.ne.s32.totalorder %s877_s6, %s572_s12  ;;  %p576_p6 = scmp.lt.u32.totalorder %s572_s12, %s877_s6 }
 0x239   :  { %p578_p7 = pnand %p576_p6, %p573_p5 }
 0x23b   :  { %581 = shalt.err (!%p578_p7)
}
 0x23c   :  { %489 = dma.vmem_to_hbm [thread:$0]  %s487_s5, 128, %s877_s6, [#allocation3]  }
 0x23d   :  { %582 = dma.done.wait [#allocation3], 128  }
 0x23e   :  { %583 = vsyncadd [#allocation3], 4294967168 }
 0x23f   :  { %493 = vsyncpa [#allocation3], 1 }

</bundles_post_ra>
